<compile_context>
chip_gen: v7x
topology: tpu7x:2x2x1
jax: 0.10.0
libtpu: 0.0.40
codegen_flags: <defaults>
</compile_context>

<pallas_src>
import jax
import jax.numpy as jnp
from jax.experimental import pallas as pl
from jax.experimental.pallas import tpu as pltpu


_LANE = 128


# ----------------------------- fused kernel -------------------------------- #

def _make_fused_mlp_kernel(num_layers, valid_out):
    """num_layers = #hidden layers + 1 output layer; valid_out = true #classes."""

    def kernel(*refs):
        x_ref, o_ref = refs[0], refs[-1]
        wb = refs[1:-1]                          # (w0, b0, w1, b1, ..., wL, bL)

        h = x_ref[...]
        # Hidden layers: Linear + ReLU (+ dropout == identity in eval mode).
        for i in range(num_layers - 1):
            w = wb[2 * i][...]
            b = wb[2 * i + 1][...]               # (1, out) -> broadcasts over rows
            h = jnp.maximum(
                jnp.dot(h, w, preferred_element_type=jnp.float32) + b, 0.0)

        # Output layer: Linear + log_softmax over the (lane-padded) class axis.
        w = wb[-2][...]
        b = wb[-1][...]
        logits = jnp.dot(h, w, preferred_element_type=jnp.float32) + b
        lane = jax.lax.broadcasted_iota(jnp.int32, logits.shape, 1)
        logits = jnp.where(lane < valid_out, logits, jnp.float32(-1e30))
        m = jnp.max(logits, axis=1, keepdims=True)
        shifted = logits - m
        lse = jnp.log(jnp.sum(jnp.exp(shifted), axis=1, keepdims=True))
        o_ref[...] = (shifted - lse).astype(o_ref.dtype)

    return kernel


def _fused_forward(x, flat_params, valid_out, padded_out):
    """flat_params = [w0, b0, ..., wL, bL]; last layer already lane-padded."""
    batch = x.shape[0]
    num_layers = len(flat_params) // 2

    flops = 0
    bytes_accessed = 4 * (x.size + batch * padded_out)
    for w in flat_params[0::2]:
        flops += 2 * batch * w.shape[0] * w.shape[1]
    for a in flat_params:
        bytes_accessed += 4 * a.size
    transcendentals = batch * padded_out         # exp in the softmax

    kernel = _make_fused_mlp_kernel(num_layers, valid_out)
    vmem = pltpu.MemorySpace.VMEM
    return pl.pallas_call(
        kernel,
        out_shape=jax.ShapeDtypeStruct((batch, padded_out), jnp.float32),
        in_specs=[pl.BlockSpec(memory_space=vmem)] * (1 + len(flat_params)),
        out_specs=pl.BlockSpec(memory_space=vmem),
        cost_estimate=pl.CostEstimate(
            flops=flops,
            transcendentals=transcendentals,
            bytes_accessed=bytes_accessed),
    )(x, *flat_params)


# ----------------------------- network ------------------------------------- #

def init_network_params(key, input_size, output_size, hidden_layers):
    """Deterministic PyTorch-Linear-style init: U(-1/sqrt(fan_in), 1/sqrt(fan_in))."""
    sizes = [input_size] + list(hidden_layers) + [output_size]
    params = []
    for fan_in, fan_out in zip(sizes[:-1], sizes[1:]):
        key, kw, kb = jax.random.split(key, 3)
        bound = 1.0 / (fan_in ** 0.5)
        # stored as (in, out): transpose of PyTorch's (out, in) weight
        w_t = jax.random.uniform(kw, (fan_in, fan_out), jnp.float32, -bound, bound)
        b = jax.random.uniform(kb, (1, fan_out), jnp.float32, -bound, bound)
        params.append((w_t, b))
    return params


@jax.jit
def network_forward(x, params):
    """Fused forward: hidden (linear+relu, dropout=id) then linear+log_softmax."""
    *hidden, (w_out, b_out) = params
    out_dim = w_out.shape[1]
    padded_out = ((out_dim + _LANE - 1) // _LANE) * _LANE   # lane-dense output
    pad = padded_out - out_dim
    w_out_p = jnp.pad(w_out, ((0, 0), (0, pad)))
    b_out_p = jnp.pad(b_out, ((0, 0), (0, pad)))

    flat = []
    for w, b in hidden:
        flat.extend([w, b])
    flat.extend([w_out_p, b_out_p])

    out_padded = _fused_forward(x, flat, out_dim, padded_out)
    return out_padded[:, :out_dim]


# ------------------------------ main ---------------------------------------- #

if __name__ == "__main__":
    key = jax.random.PRNGKey(0)

    batch = 8
    input_size = 64
    hidden_layers = [128, 64]
    output_size = 10

    kx, kp = jax.random.split(key)
    x = jax.random.normal(kx, (batch, input_size), jnp.float32)
    params = tuple(init_network_params(kp, input_size, output_size, hidden_layers))

    out = network_forward(x, params)
    out = jax.block_until_ready(out)

    # pure-JAX reference for correctness
    def reference_forward(x, params):
        *hidden, (w_out, b_out) = params
        h = x
        for w, b in hidden:
            h = jnp.maximum(h @ w + b, 0.0)
        logits = h @ w_out + b_out
        return jax.nn.log_softmax(logits, axis=1)

    ref = reference_forward(x, params)

    assert out.shape == (batch, output_size)
    row_sums = jnp.sum(jnp.exp(out), axis=1)
    assert bool(jnp.all(jnp.abs(row_sums - 1.0) < 1e-4))
    assert bool(jnp.max(jnp.abs(out - ref)) < 2e-2)

    print("KERNEL_OK")
</pallas_src>

<mosaic_0001>
module attributes {stable_mosaic.version = 11 : i64} {
  func.func @kernel(%arg0: memref<8x64xf32, #tpu.memory_space<vmem>>, %arg1: memref<64x128xf32, #tpu.memory_space<vmem>>, %arg2: memref<1x128xf32, #tpu.memory_space<vmem>>, %arg3: memref<128x64xf32, #tpu.memory_space<vmem>>, %arg4: memref<1x64xf32, #tpu.memory_space<vmem>>, %arg5: memref<64x128xf32, #tpu.memory_space<vmem>>, %arg6: memref<1x128xf32, #tpu.memory_space<vmem>>, %arg7: memref<8x128xf32, #tpu.memory_space<vmem>>) attributes {dimension_semantics = [], scalar_prefetch = 0 : i64, scratch_operands = 0 : i64, tpu.core_type = #tpu.core_type<tc>} {
    %c0 = arith.constant 0 : index
    %c0_0 = arith.constant 0 : index
    %0 = vector.load %arg0[%c0, %c0_0] : memref<8x64xf32, #tpu.memory_space<vmem>>, vector<8x64xf32>
    %c0_1 = arith.constant 0 : index
    %c0_2 = arith.constant 0 : index
    %1 = vector.load %arg1[%c0_1, %c0_2] : memref<64x128xf32, #tpu.memory_space<vmem>>, vector<64x128xf32>
    %c0_3 = arith.constant 0 : index
    %c0_4 = arith.constant 0 : index
    %2 = vector.load %arg2[%c0_3, %c0_4] : memref<1x128xf32, #tpu.memory_space<vmem>>, vector<1x128xf32>
    %cst = arith.constant dense<0.000000e+00> : vector<8x128xf32>
    %3 = tpu.matmul %0, %1, %cst {dimension_numbers = #tpu.dot_dimension_numbers<[1], [0], [0], [1], [0, 0, 1, 1], [], []>} : vector<8x64xf32>, vector<64x128xf32>, vector<8x128xf32> -> vector<8x128xf32>
    %4 = vector.broadcast %2 : vector<1x128xf32> to vector<8x128xf32>
    %5 = arith.addf %3, %4 : vector<8x128xf32>
    %cst_5 = arith.constant 0.000000e+00 : f32
    %6 = vector.broadcast %cst_5 : f32 to vector<8x128xf32>
    %7 = arith.maximumf %5, %6 : vector<8x128xf32>
    %c0_6 = arith.constant 0 : index
    %c0_7 = arith.constant 0 : index
    %8 = vector.load %arg3[%c0_6, %c0_7] : memref<128x64xf32, #tpu.memory_space<vmem>>, vector<128x64xf32>
    %c0_8 = arith.constant 0 : index
    %c0_9 = arith.constant 0 : index
    %9 = vector.load %arg4[%c0_8, %c0_9] : memref<1x64xf32, #tpu.memory_space<vmem>>, vector<1x64xf32>
    %cst_10 = arith.constant dense<0.000000e+00> : vector<8x64xf32>
    %10 = tpu.matmul %7, %8, %cst_10 {dimension_numbers = #tpu.dot_dimension_numbers<[1], [0], [0], [1], [0, 0, 1, 1], [], []>} : vector<8x128xf32>, vector<128x64xf32>, vector<8x64xf32> -> vector<8x64xf32>
    %11 = vector.broadcast %9 : vector<1x64xf32> to vector<8x64xf32>
    %12 = arith.addf %10, %11 : vector<8x64xf32>
    %cst_11 = arith.constant 0.000000e+00 : f32
    %13 = vector.broadcast %cst_11 : f32 to vector<8x64xf32>
    %14 = arith.maximumf %12, %13 : vector<8x64xf32>
    %c0_12 = arith.constant 0 : index
    %c0_13 = arith.constant 0 : index
    %15 = vector.load %arg5[%c0_12, %c0_13] : memref<64x128xf32, #tpu.memory_space<vmem>>, vector<64x128xf32>
    %c0_14 = arith.constant 0 : index
    %c0_15 = arith.constant 0 : index
    %16 = vector.load %arg6[%c0_14, %c0_15] : memref<1x128xf32, #tpu.memory_space<vmem>>, vector<1x128xf32>
    %cst_16 = arith.constant dense<0.000000e+00> : vector<8x128xf32>
    %17 = tpu.matmul %14, %15, %cst_16 {dimension_numbers = #tpu.dot_dimension_numbers<[1], [0], [0], [1], [0, 0, 1, 1], [], []>} : vector<8x64xf32>, vector<64x128xf32>, vector<8x128xf32> -> vector<8x128xf32>
    %18 = vector.broadcast %16 : vector<1x128xf32> to vector<8x128xf32>
    %19 = arith.addf %17, %18 : vector<8x128xf32>
    %20 = tpu.iota {dimensions = array<i32: 1>} : vector<8x128xi32>
    %c10_i32 = arith.constant 10 : i32
    %21 = vector.broadcast %c10_i32 : i32 to vector<8x128xi32>
    %22 = arith.cmpi slt, %20, %21 : vector<8x128xi32>
    %cst_17 = arith.constant -1.000000e+30 : f32
    %23 = vector.broadcast %cst_17 : f32 to vector<8x128xf32>
    %24 = arith.select %22, %19, %23 : vector<8x128xi1>, vector<8x128xf32>
    %cst_18 = arith.constant dense<0xFF800000> : vector<8xf32>
    %25 = vector.multi_reduction <maximumf>, %24, %cst_18 [1] : vector<8x128xf32> to vector<8xf32>
    %26 = vector.shape_cast %25 : vector<8xf32> to vector<8x1xf32>
    %27 = vector.broadcast %26 : vector<8x1xf32> to vector<8x128xf32>
    %28 = arith.subf %24, %27 : vector<8x128xf32>
    %29 = math.exp %28 : vector<8x128xf32>
    %cst_19 = arith.constant dense<0.000000e+00> : vector<8xf32>
    %30 = vector.multi_reduction <add>, %29, %cst_19 [1] : vector<8x128xf32> to vector<8xf32>
    %31 = vector.shape_cast %30 : vector<8xf32> to vector<8x1xf32>
    %32 = math.log %31 : vector<8x1xf32>
    %33 = vector.broadcast %32 : vector<8x1xf32> to vector<8x128xf32>
    %34 = arith.subf %28, %33 : vector<8x128xf32>
    %c0_20 = arith.constant 0 : index
    %c0_21 = arith.constant 0 : index
    %35 = vector.load %arg7[%c0_20, %c0_21] : memref<8x128xf32, #tpu.memory_space<vmem>>, vector<8x128xf32>
    tpu.vector_store %arg7[%c0_20, %c0_21], %34 {strides = array<i32>} : memref<8x128xf32, #tpu.memory_space<vmem>>, vector<8x128xf32>,
    return
  }
}

</mosaic_0001>

<bundles_post_ra>
// kernel: network_forward.1
= control target key start
LH: loop header
LB: loop body
LE: loop exit
PB: predicated region body
PF: predicated region fallthrough
CT: control target
= control target key end

     0   :  { %v522_v3 = vmov 0.0|0.0   ;;  %vm523_vm0 = vmmov 0   ;;  %v524_v6 = vmov 0.0   ;;  %s707_s0 = inlined_call_operand.vmem [shape: f32[8,64], index: 0, kind: input, shape index: {}]   ;;  %s708_s1 = inlined_call_operand.vmem [shape: f32[64,128], index: 1, kind: input, shape index: {}]   ;;  %s709_s2 = inlined_call_operand.vmem [shape: f32[1,128], index: 2, kind: input, shape index: {}]   ;;  %s710_s3 = inlined_call_operand.vmem [shape: f32[128,64], index: 3, kind: input, shape index: {}]   ;;  %s711_s4 = inlined_call_operand.vmem [shape: f32[1,64], index: 4, kind: input, shape index: {}]   ;;  %s712_s5 = inlined_call_operand.vmem [shape: f32[64,128], index: 5, kind: input, shape index: {}]   ;;  %s713_s6 = inlined_call_operand.vmem [shape: f32[1,128], index: 6, kind: input, shape index: {}]   ;;  %s714_s7 = inlined_call_operand.hbm [shape: f32[8,128], index: 7, kind: output, shape index: {}]  }
   0x1   :  { %v28_v0 = vld [vmem:[%s708_s1] sm:$0xff]  ;;  %v29_v1 = vld [vmem:[%s708_s1 + $0x8] sm:$0xff]  ;;  %v30_v2 = vld [vmem:[%s708_s1 + $0x10] sm:$0xff]  ;;  %442 = vmatprep.subr.bf16.mxu0 %v522_v3  ;;  %385 = vmatprep.mubr.msk.f32.mxu0 %vm523_vm0, %v524_v6 }
   0x2   :  { %v443_v4 = vpack.c.bf16 %v29_v1, %v28_v0  ;;  %v31_v5 = vld [vmem:[%s708_s1 + $0x18] sm:$0xff]  ;;  %454 = vmatprep.subr.bf16.mxu1 %v522_v3  ;;  %420 = vmatprep.mubr.msk.f32.mxu1 %vm523_vm0, %v524_v6  ;;  %v118_v8 = vld [vmem:[%s710_s3] sm:$0xff]  ;;  %v119_v9 = vld [vmem:[%s710_s3 + $0x8] sm:$0xff] }
   0x3   :  { %v446_v7 = vpack.c.bf16 %v31_v5, %v30_v2  ;;  %v120_v10 = vld [vmem:[%s710_s3 + $0x10] sm:$0xff]  ;;  %v32_v11 = vld [vmem:[%s708_s1 + $0x20] sm:$0xff]  ;;  %v33_v12 = vld [vmem:[%s708_s1 + $0x28] sm:$0xff]  ;;  %v455_v13 = vpack.c.bf16 %v119_v9, %v118_v8 }
   0x4   :  { %444 = vmatpush3.bf16.msra.mxu0 %v443_v4  ;;  %v121_v14 = vld [vmem:[%s710_s3 + $0x18] sm:$0xff]  ;;  %v449_v16 = vpack.c.bf16 %v33_v12, %v32_v11  ;;  %v122_v17 = vld [vmem:[%s710_s3 + $0x20] sm:$0xff]  ;;  %v123_v18 = vld [vmem:[%s710_s3 + $0x28] sm:$0xff] }
   0x5   :  { %445 = vmatprep.subr.bf16.mxu0 %v522_v3  ;;  %456 = vmatpush3.bf16.msra.mxu1 %v455_v13  ;;  %v458_v15 = vpack.c.bf16 %v121_v14, %v120_v10  ;;  %v34_v19 = vld [vmem:[%s708_s1 + $0x30] sm:$0xff]  ;;  %v35_v20 = vld [vmem:[%s708_s1 + $0x38] sm:$0xff] }
   0x6   :  { %457 = vmatprep.subr.bf16.mxu1 %v522_v3 }
   0x8   :  { %447 = vmatpush3.bf16.msra.mxu0 %v446_v7 }
   0x9   :  { %448 = vmatprep.subr.bf16.mxu0 %v522_v3 }
   0xa   :  { %12 = vsyncpa [#allocation3], 0  ;;  %459 = vmatpush3.bf16.msra.mxu1 %v458_v15  ;;  %v461_v21 = vpack.c.bf16 %v123_v18, %v122_v17  ;;  %v452_v22 = vpack.c.bf16 %v35_v20, %v34_v19  ;;  %v124_v23 = vld [vmem:[%s710_s3 + $0x30] sm:$0xff]  ;;  %v125_v24 = vld [vmem:[%s710_s3 + $0x38] sm:$0xff]  ;;  %vm43_vm1 = vcmask 523264   ;;  %v300_v61 = vlaneseq }
   0xb   :  { %460 = vmatprep.subr.bf16.mxu1 %v522_v3  ;;  %v464_v25 = vpack.c.bf16 %v125_v24, %v124_v23  ;;  %v27_v26 = vld [vmem:[%s707_s0] sm:$0xff]  ;;  %v127_v28 = vld [vmem:[%s710_s3 + $0x48] sm:$0xff]  ;;  %v128_v30 = vld [vmem:[%s710_s3 + $0x50] sm:$0xff] }
   0xc   :  { %450 = vmatpush3.bf16.msra.mxu0 %v449_v16  ;;  %v126_v27 = vld [vmem:[%s710_s3 + $0x40] sm:$0xff]  ;;  %v129_v31 = vld [vmem:[%s710_s3 + $0x58] sm:$0xff]  ;;  %v131_v34 = vld [vmem:[%s710_s3 + $0x68] sm:$0xff]  ;;  %v301_v62 = vand.u32 127, %v300_v61 }
   0xd   :  { %451 = vmatprep.subr.bf16.mxu0 %v522_v3  ;;  %v467_v29 = vpack.c.bf16 %v127_v28, %v126_v27  ;;  %v470_v32 = vpack.c.bf16 %v129_v31, %v128_v30  ;;  %v130_v33 = vld [vmem:[%s710_s3 + $0x60] sm:$0xff]  ;;  %v132_v36 = vld [vmem:[%s710_s3 + $0x70] sm:$0xff]  ;;  %v133_v37 = vld [vmem:[%s710_s3 + $0x78] sm:$0xff] }
   0xe   :  { %462 = vmatpush3.bf16.msra.mxu1 %v461_v21  ;;  %v473_v35 = vpack.c.bf16 %v131_v34, %v130_v33  ;;  %v476_v38 = vpack.c.bf16 %v133_v37, %v132_v36  ;;  %v212_v39 = vld [vmem:[%s712_s5] sm:$0xff]  ;;  %v213_v40 = vld [vmem:[%s712_s5 + $0x8] sm:$0xff]  ;;  %v214_v41 = vld [vmem:[%s712_s5 + $0x10] sm:$0xff]  ;;  %vm302_vm2 = vcmp.lt.s32.totalorder %v301_v62, 10 }
   0xf   :  { %463 = vmatprep.subr.bf16.mxu1 %v522_v3  ;;  %v479_v42 = vpack.c.bf16 %v213_v40, %v212_v39  ;;  %v215_v43 = vld [vmem:[%s712_s5 + $0x18] sm:$0xff]  ;;  %v216_v45 = vld [vmem:[%s712_s5 + $0x20] sm:$0xff]  ;;  %v217_v46 = vld [vmem:[%s712_s5 + $0x28] sm:$0xff] }
  0x10   :  { %453 = vmatpush3.bf16.msra.mxu0 %v452_v22  ;;  %v482_v44 = vpack.c.bf16 %v215_v43, %v214_v41  ;;  %v485_v47 = vpack.c.bf16 %v217_v46, %v216_v45  ;;  %v329_v48 = vld [vmem:[%s709_s2] ss:$0 sm:$0xff]  ;;  %v218_v53 = vld [vmem:[%s712_s5 + $0x30] sm:$0xff]  ;;  %v219_v54 = vld [vmem:[%s712_s5 + $0x38] sm:$0xff] }
  0x11   :  { %478 = vmatprep.subr.bf16.mxu0 %v522_v3  ;;  %v488_v55 = vpack.c.bf16 %v219_v54, %v218_v53  ;;  %v331_v56 = vld [vmem:[%s711_s4] ss:$0 sm:$0xff]  ;;  %s525_s4 = smov [#allocation2]  }
  0x12   :  { %465 = vmatpush3.bf16.msra.mxu1 %v464_v25  ;;  %v332_v63 = vld [vmem:[%s713_s6] ss:$0 sm:$0xff]  ;;  %s321_s5 = sshll.u32 %s525_s4, 4  ;;  %s322_s5 = int_to_ptr.vmem [resolvable:$true] %s321_s5 }
  0x13   :  { %386 = vmatmul.mubr.msk.f32.vlgmr.msra.gmra.mrb[0].mxu0 %vm43_vm1, %v27_v26  ;;  %466 = vmatprep.subr.bf16.mxu1 %v522_v3  ;;  %s498_s6 = scalar_lea.vmem %s322_s5, 128  ;;  %p503_p1 = scmp.lt.s32.totalorder %s322_s5, %s322_s5 }
  0x14   :  { %439 = vmatprep.mubr.msk.f32.mxu0 %vm523_vm0, %v524_v6  ;;  %480 = vmatpush3.bf16.msra.mxu0 %v479_v42  ;;  %p499_p0 = scmp.ne.s32.totalorder %s322_s5, %s498_s6  ;;  %p504_p2 = scmp.lt.s32.totalorder %s498_s6, %s498_s6 }
  0x15   :  { %481 = vmatprep.subr.bf16.mxu0 %v522_v3 }
  0x16   :  { %468 = vmatpush3.bf16.msra.mxu1 %v467_v29  ;;  %p505_p3 = por %p504_p2, %p503_p1 }
  0x17   :  { %469 = vmatprep.subr.bf16.mxu1 %v522_v3 }
  0x18   :  { %483 = vmatpush3.bf16.msra.mxu0 %v482_v44  ;;  %p506_p4 = pnand %p505_p3, %p499_p0 }
  0x19   :  { %484 = vmatprep.subr.bf16.mxu0 %v522_v3 }
  0x1a   :  { %471 = vmatpush3.bf16.msra.mxu1 %v470_v32 }
  0x1b   :  { %472 = vmatprep.subr.bf16.mxu1 %v522_v3 }
  0x1c   :  { %486 = vmatpush3.bf16.msra.mxu0 %v485_v47 }
  0x1d   :  { %487 = vmatprep.subr.bf16.mxu0 %v522_v3 }
  0x1e   :  { %474 = vmatpush3.bf16.msra.mxu1 %v473_v35 }
  0x1f   :  { %475 = vmatprep.subr.bf16.mxu1 %v522_v3 }
  0x20   :  { %489 = vmatpush3.bf16.msra.mxu0 %v488_v55 }
  0x22   :  { %477 = vmatpush3.bf16.msra.mxu1 %v476_v38 }
  0xe6   :  { %v113_v49 = vpop.f32.mrb[0].mxu0 }
  0xe7   :  { %v114_v50 = vadd.f32 %v329_v48, %v113_v49  ;;  %v387_v51 = vpop.f32.mrb[1].mxu0 }
  0xe9   :  { %v117_v52 = vmax.f32 %v114_v50, 0.0 }
  0xeb   :  { %421 = vmatmul.mubr.f32.vlgmr.msra.gmra.mrb[0].mxu1 %v117_v52 }
 0x1be   :  { %v207_v57 = vpop.f32.mrb[0].mxu1 }
 0x1bf   :  { %v208_v58 = vadd.f32 %v331_v56, %v207_v57  ;;  %v422_v59 = vpop.f32.mrb[1].mxu1 }
 0x1c1   :  { %v211_v60 = vmax.f32 %v208_v58, 0.0 }
 0x1c3   :  { %440 = vmatmul.mubr.msk.f32.vlgmr.msra.gmra.mrb[2].mxu0 %vm43_vm1, %v211_v60 }
 0x296   :  { %v296_v0 = vpop.f32.mrb[2].mxu0 }
 0x297   :  { %v297_v1 = vadd.f32 %v332_v63, %v296_v0  ;;  %v441_v2 = vpop.f32.mrb[3].mxu0 }
 0x299   :  { %v303_v3 = vsel %vm302_vm2, %v297_v1, -1e+30 }
 0x29a   :  { %304 = vmax.xlane.f32.xlu0 %v303_v3 }
 0x327   :  { %v305_v4 = vpop.xlane.xlu0 %304 }
 0x328   :  { %v306_v5 = vsub.f32 %v303_v3, %v305_v4 }
 0x32a   :  { %v307_v6 = vmul.f32 1.442695, %v306_v5 }
 0x32c   :  { %494 = vpow2.f32 %v307_v6 }
 0x336   :  { %v495_v7 = vpop.eup %494 }
 0x337   :  { %309 = vadd.xlane.f32.xlu0 %v495_v7 }
 0x3c4   :  { %v310_v8 = vpop.xlane.xlu0 %309 }
 0x3c5   :  { %496 = vlog2.f32 %v310_v8 }
 0x3cf   :  { %v497_v9 = vpop.eup %496 }
 0x3d0   :  { %v312_v10 = vmul.f32 0.6931472, %v497_v9 }
 0x3d2   :  { %v313_v11 = vsub.f32 %v306_v5, %v312_v10 }
 0x3d4   :  { %314 = vst [vmem:[#allocation2] sm:$0xff] %v313_v11 }
 0x3d5   :  { %509 = shalt.err (!%p506_p4)
}
 0x3d6   :  { %s510_s23 = scalar_lea.hbm %s714_s7, 128 }
 0x3d7   :  { %p511_p5 = scmp.ne.s32.totalorder %s714_s7, %s510_s23  ;;  %p514_p6 = scmp.lt.u32.totalorder %s510_s23, %s714_s7 }
 0x3d9   :  { %p516_p7 = pnand %p514_p6, %p511_p5 }
 0x3db   :  { %519 = shalt.err (!%p516_p7)
}
 0x3dc   :  { %324 = dma.vmem_to_hbm [thread:$0]  %s322_s5, 128, %s714_s7, [#allocation3]  }
 0x3dd   :  { %520 = dma.done.wait [#allocation3], 128  }
 0x3de   :  { %521 = vsyncadd [#allocation3], 4294967168 }
 0x3df   :  { %328 = vsyncpa [#allocation3], 1 }

</bundles_post_ra>
